<compile_context>
chip_gen: v7x
topology: tpu7x:2x2x1
jax: 0.10.0
libtpu: 0.0.40
codegen_flags: <defaults>
</compile_context>

<pallas_src>
import functools

import jax
import jax.numpy as jnp
import numpy as np
from jax import lax
from jax.experimental import pallas as pl
from jax.experimental.pallas import tpu as pltpu


def _round_up(a: int, b: int) -> int:
    return -(-a // b) * b


def _vmem_capacity_bytes() -> int:
    """Per-TensorCore VMEM capacity; conservative fallback = v7x's 64 MiB."""
    try:
        info = pltpu.get_tpu_info()
        cap = int(getattr(info, "vmem_capacity_bytes", 0) or 0)
        if cap > 0:
            return cap
    except Exception:
        pass
    return 64 * 1024 * 1024


def _adaptive_pool_matrix(length: int, out_size: int,
                          padded_length: int) -> jnp.ndarray:
    """Exact AdaptiveAvgPool1d(out_size) as a (padded_length, out_size)
    averaging matrix (already transposed for a plain y @ P matmul).  Rows past
    `length` are zero, so zero-padded x columns contribute nothing."""
    P = np.zeros((padded_length, out_size), dtype=np.float32)
    for o in range(out_size):
        start = (o * length) // out_size
        end = -(-((o + 1) * length) // out_size)   # ceil((o+1)*L/out)
        P[start:end, o] = 1.0 / (end - start)
    return jnp.asarray(P)


def _hist_kernel(x_ref, w_ref, b_ref, pool_ref, o_ref, *,
                 block_n: int, tile_l: int, normalize_bins: bool,
                 pool_resident: bool):
    l = pl.program_id(1)

    # Output tile is VMEM-resident across the l axis (index map depends only
    # on n) -> use it directly as the accumulator.
    @pl.when(l == 0)
    def _():
        o_ref[...] = jnp.zeros_like(o_ref)

    w = w_ref[...]                      # (bins_pad, C_in)   widths folded in
    b = b_ref[...]                      # (bins_pad, 1) f32  widths folded in

    if pool_resident:
        # Full (L_pad, out) pool matrix is resident; slice this L tile once
        # per grid step (outside the batch loop).
        start = pl.multiple_of(l * tile_l, 128)
        pool = pool_ref[pl.ds(start, tile_l), :]        # (TL, out)
    else:
        pool = pool_ref[...]                            # (TL, out)

    def body(i, carry):
        x = x_ref[i]                                    # (C_in, TL)
        # bin_centers_conv + bin_widths_conv folded: y = (widths*W)@x + widths*bias
        y = jnp.dot(w, x, preferred_element_type=jnp.float32) + b  # (bins_pad, TL)
        # RBF membership
        y = jnp.exp(-(y * y))
        if normalize_bins:
            denom = jnp.sum(y, axis=0, keepdims=True) + 1e-5       # (1, TL)
            inv = pl.reciprocal(denom, approx=True)                # EUP
            inv = inv * (2.0 - denom * inv)                        # one NR step
            y = y * inv
        # AdaptiveAvgPool1d slice: contract this L tile, accumulate into o_ref.
        o_ref[i] = o_ref[i] + jnp.dot(y, pool,
                                      preferred_element_type=jnp.float32)
        return carry

    lax.fori_loop(0, block_n, body, 0, unroll=True)


def histogram_layer(x, w, bias, widths, *, num_bins, output_size,
                    kernel_size=1, dim=1, normalize_count=True,
                    normalize_bins=True, block_n=None, block_l=None,
                    pool_resident=None):
    """x: (N, C_in, L) float32 or bfloat16.  Returns (N, num_bins, output_size)."""
    N, C_in, L = x.shape
    orig_dtype = x.dtype

    # Stream bf16 as-is (dominant HBM stream); everything else goes through f32.
    if x.dtype == jnp.bfloat16:
        x_k = x
    else:
        x_k = x.astype(jnp.float32)

    # ---- fold the depthwise width conv and the bias into the first matmul ----
    w_eff = (widths[:, None].astype(jnp.float32) * w.astype(jnp.float32))
    b_eff = (widths.astype(jnp.float32) * bias.astype(jnp.float32))

    # ---- pad num_bins to the f32 sublane granule (8) ----
    bins_pad = _round_up(num_bins, 8)
    extra = bins_pad - num_bins
    if extra:
        w_eff = jnp.concatenate(
            [w_eff, jnp.zeros((extra, C_in), jnp.float32)], axis=0)
        # Huge bias -> exp(-(1e4)^2) == 0 exactly: padded bins neither disturb
        # the per-column normalization nor contribute to the output.
        b_eff = jnp.concatenate(
            [b_eff, jnp.full((extra,), 1e4, jnp.float32)], axis=0)
    b_eff = b_eff.reshape(bins_pad, 1)
    if x_k.dtype == jnp.bfloat16:
        w_eff = w_eff.astype(jnp.bfloat16)   # bf16 MXU path; acc stays f32

    # ---- generation-aware VMEM budget (64 MiB/TC on v7x, 128 MiB v5e/v6e) ----
    vmem_cap = _vmem_capacity_bytes()
    vmem_limit = min(vmem_cap * 3 // 4, 96 * 1024 * 1024)
    budget = min(vmem_cap // 2, 48 * 1024 * 1024)

    itemsize_x = x_k.dtype.itemsize
    L_ru = _round_up(L, 128)
    out_lanes = _round_up(max(output_size, 1), 128)   # VMEM lane padding
    # Upper bound on the resident pool footprint (TL <= 2048 -> L_pad <= L+2048)
    pool_bytes_ub = (_round_up(L, 128) + 2048) * out_lanes * 4
    if pool_resident is None:
        pool_resident = pool_bytes_ub <= (2 * 1024 * 1024)

    def _resident_bytes(bn):
        r = bins_pad * _round_up(C_in, 128) * w_eff.dtype.itemsize   # weights
        r += bins_pad * 128 * 4                                      # bias
        r += 2 * bn * bins_pad * out_lanes * 4                       # output blocks
        if pool_resident:
            r += pool_bytes_ub
        return r

    def _per_col_bytes(bn):
        p = bn * C_in * itemsize_x * 2            # x, double-buffered
        p += (bins_pad + C_in) * 4                # y + promoted-x intermediates
        if not pool_resident:
            p += 2 * out_lanes * 4                # streamed pool, double-buffered
        return p

    def _tl_for(bn):
        avail = budget - _resident_bytes(bn)
        if avail <= 0:
            return 0
        tl = (avail // _per_col_bytes(bn)) // 128 * 128
        return max(0, min(tl, 2048, L_ru))

    # ---- batch block: amortize per-step overhead, keep >=2 parallel steps ----
    if block_n is None:
        bn = 8
        if N >= 2:
            bn = min(bn, max(1, N // 2))   # both v7x TensorCores get work
        # shrink BN before TL when the VMEM budget is tight (TL floor = 512)
        tl_floor = min(512, L_ru)
        while bn > 1 and _tl_for(bn) < tl_floor:
            bn //= 2
        block_n = max(1, bn)
    BN = block_n

    # ---- L tile: lane axis, multiple of 128, as large as the budget allows ----
    if block_l is None:
        block_l = max(128, _tl_for(BN))
        block_l = min(block_l, L_ru)
    assert block_l % 128 == 0
    TL = block_l

    # ---- pad N (zero rows) and L (zero columns); sliced off afterwards ----
    N_pad = _round_up(N, BN)
    if N_pad != N:
        x_k = jnp.pad(x_k, ((0, N_pad - N), (0, 0), (0, 0)))
    L_pad = _round_up(L, TL)
    if L_pad != L:
        x_k = jnp.pad(x_k, ((0, 0), (0, 0), (0, L_pad - L)))

    pool_mat = _adaptive_pool_matrix(L, output_size, L_pad)   # (L_pad, out)

    grid = (N_pad // BN, L_pad // TL)

    if pool_resident:
        pool_spec = pl.BlockSpec((L_pad, output_size), lambda n, l: (0, 0))
    else:
        pool_spec = pl.BlockSpec((TL, output_size), lambda n, l: (l, 0))

    kernel = functools.partial(_hist_kernel, block_n=BN, tile_l=TL,
                               normalize_bins=normalize_bins,
                               pool_resident=pool_resident)

    cost = pl.CostEstimate(
        flops=int(2 * N * num_bins * L * (C_in + output_size)),
        transcendentals=int(2 * N * num_bins * L),
        bytes_accessed=int(itemsize_x * N_pad * C_in * L_pad
                           + 4 * N_pad * bins_pad * output_size
                           + w_eff.size * w_eff.dtype.itemsize
                           + 4 * b_eff.size
                           + 4 * pool_mat.size * (1 if pool_resident
                                                  else grid[0])),
    )

    out_padded = pl.pallas_call(
        kernel,
        out_shape=jax.ShapeDtypeStruct((N_pad, bins_pad, output_size),
                                       jnp.float32),
        grid_spec=pltpu.PrefetchScalarGridSpec(
            num_scalar_prefetch=0,
            grid=grid,
            in_specs=[
                pl.BlockSpec((BN, C_in, TL), lambda n, l: (n, 0, l)),
                pl.BlockSpec((bins_pad, C_in), lambda n, l: (0, 0)),
                pl.BlockSpec((bins_pad, 1), lambda n, l: (0, 0)),
                pool_spec,
            ],
            out_specs=pl.BlockSpec((BN, bins_pad, output_size),
                                   lambda n, l: (n, 0, 0)),
        ),
        compiler_params=pltpu.CompilerParams(
            dimension_semantics=("parallel", "arbitrary"),
            vmem_limit_bytes=int(vmem_limit)),
        cost_estimate=cost,
    )(x_k, w_eff, b_eff, pool_mat)

    out = out_padded[:N, :num_bins, :]
    if not normalize_count:
        out = (kernel_size ** dim) * out
    if orig_dtype == jnp.bfloat16:
        out = out.astype(orig_dtype)
    return out


def _reference(x, w, bias, widths, *, num_bins, output_size,
               kernel_size=1, dim=1, normalize_count=True,
               normalize_bins=True):
    """Pure-JAX reference mirroring the PyTorch forward (f32)."""
    x = x.astype(jnp.float32)
    y = jnp.einsum('bc,ncl->nbl', w, x) + bias[None, :, None]
    y = widths[None, :, None] * y
    y = jnp.exp(-(y ** 2))
    if normalize_bins:
        s = jnp.sum(y, axis=1, keepdims=True) + 1e-5
        y = y / s
    L = x.shape[-1]
    P = _adaptive_pool_matrix(L, output_size, L)          # (L, out)
    out = jnp.einsum('nbl,lo->nbo', y, P)
    if not normalize_count:
        out = (kernel_size ** dim) * out
    return out


if __name__ == "__main__":
    # Small shapes consistent with the module (dim=1 Conv1d path).  L chosen so
    # the L-tiled accumulation, the L / N / bin padding, and the resident-pool
    # in-kernel slicing are exercised (L=160 -> padded to 256 with block_l=128).
    N, C_IN, L = 2, 8, 160
    NUM_BINS = 4
    OUTPUT_SIZE = 4
    KERNEL_SIZE = 4   # only used when normalize_count=False (default is True)

    key = jax.random.PRNGKey(0)
    kx, kw, kb, kwd = jax.random.split(key, 4)

    x = jax.random.normal(kx, (N, C_IN, L), dtype=jnp.float32)
    # bin_centers_conv: Conv1d(in_channels, numBins, 1, bias=True)
    #   weight (numBins, in_channels, 1) -> stored here as (numBins, in_channels)
    w = 0.2 * jax.random.normal(kw, (NUM_BINS, C_IN), dtype=jnp.float32)
    bias = jax.random.normal(kb, (NUM_BINS,), dtype=jnp.float32)
    # bin_widths_conv: Conv1d(numBins, numBins, 1, groups=numBins, bias=False)
    #   weight (numBins, 1, 1) -> stored here as (numBins,)
    widths = 1.0 + 0.1 * jax.random.normal(kwd, (NUM_BINS,), dtype=jnp.float32)

    ref = _reference(x, w, bias, widths,
                     num_bins=NUM_BINS, output_size=OUTPUT_SIZE,
                     kernel_size=KERNEL_SIZE, dim=1,
                     normalize_count=True, normalize_bins=True)
    ref = jax.block_until_ready(ref)

    # f32 path: explicit small L tile exercises the L-tiled accumulation,
    # padding paths, and the resident-pool pl.ds slicing.
    out = histogram_layer(x, w, bias, widths,
                          num_bins=NUM_BINS, output_size=OUTPUT_SIZE,
                          kernel_size=KERNEL_SIZE, dim=1,
                          normalize_count=True, normalize_bins=True,
                          block_l=128)
    out = jax.block_until_ready(out)
    assert out.shape == (N, NUM_BINS, OUTPUT_SIZE), out.shape
    np.testing.assert_allclose(np.asarray(out), np.asarray(ref),
                               rtol=1e-5, atol=1e-5)

    # bf16-streamed path with the auto tiling heuristic and the streamed-pool
    # fallback (looser tolerance: bf16 inputs / bf16 output).
    out_bf16 = histogram_layer(x.astype(jnp.bfloat16), w, bias, widths,
                               num_bins=NUM_BINS, output_size=OUTPUT_SIZE,
                               kernel_size=KERNEL_SIZE, dim=1,
                               normalize_count=True, normalize_bins=True,
                               pool_resident=False)
    out_bf16 = jax.block_until_ready(out_bf16)
    assert out_bf16.shape == (N, NUM_BINS, OUTPUT_SIZE), out_bf16.shape
    np.testing.assert_allclose(np.asarray(out_bf16, dtype=np.float32),
                               np.asarray(ref), rtol=5e-2, atol=5e-2)

    print("KERNEL_OK")
</pallas_src>

<mosaic_0001>
module attributes {stable_mosaic.version = 11 : i64} {
  func.func @_hist_kernel(%arg0: i32, %arg1: i32, %arg2: memref<1x8x128xf32, #tpu.memory_space<vmem>>, %arg3: memref<8x8xf32, #tpu.memory_space<vmem>>, %arg4: memref<8x1xf32, #tpu.memory_space<vmem>>, %arg5: memref<256x4xf32, #tpu.memory_space<vmem>>, %arg6: memref<1x8x4xf32, #tpu.memory_space<vmem>>) attributes {dimension_semantics = [#tpu.dimension_semantics<parallel>, #tpu.dimension_semantics<arbitrary>], iteration_bounds = array<i64: 2, 2>, scalar_prefetch = 0 : i64, scratch_operands = 0 : i64, tpu.core_type = #tpu.core_type<tc>, window_params = [{transform_indices = @transform_0, window_bounds = array<i64: 1, 8, 128>}, {pipeline_mode = #tpu.pipeline_mode<synchronous>, transform_indices = @transform_1, window_bounds = array<i64: 8, 8>}, {pipeline_mode = #tpu.pipeline_mode<synchronous>, transform_indices = @transform_2, window_bounds = array<i64: 8, 1>}, {pipeline_mode = #tpu.pipeline_mode<synchronous>, transform_indices = @transform_3, window_bounds = array<i64: 256, 4>}, {transform_indices = @transform_4, window_bounds = array<i64: 1, 8, 4>}]} {
    %c0_i32 = arith.constant 0 : i32
    %0 = arith.cmpi eq, %arg1, %c0_i32 : i32
    %1 = arith.extui %0 : i1 to i32
    %c0_i32_0 = arith.constant 0 : i32
    %2 = arith.cmpi ne, %1, %c0_i32_0 : i32
    scf.if %2 {
      %cst_17 = arith.constant 0.000000e+00 : f32
      %39 = vector.broadcast %cst_17 : f32 to vector<1x8x4xf32>
      %c0_18 = arith.constant 0 : index
      %c0_19 = arith.constant 0 : index
      %c0_20 = arith.constant 0 : index
      %40 = vector.load %arg6[%c0_18, %c0_19, %c0_20] : memref<1x8x4xf32, #tpu.memory_space<vmem>>, vector<1x8x4xf32>
      tpu.vector_store %arg6[%c0_18, %c0_19, %c0_20], %39 {strides = array<i32>} : memref<1x8x4xf32, #tpu.memory_space<vmem>>, vector<1x8x4xf32>,
    } else {
    }
    %c0 = arith.constant 0 : index
    %c0_1 = arith.constant 0 : index
    %3 = vector.load %arg3[%c0, %c0_1] : memref<8x8xf32, #tpu.memory_space<vmem>>, vector<8x8xf32>
    %c0_2 = arith.constant 0 : index
    %c0_3 = arith.constant 0 : index
    %4 = vector.load %arg4[%c0_2, %c0_3] : memref<8x1xf32, #tpu.memory_space<vmem>>, vector<8x1xf32>
    %c128_i32 = arith.constant 128 : i32
    %5 = arith.muli %arg1, %c128_i32 : i32
    %6 = tpu.assume_multiple %5, 128 : i32
    %7 = arith.index_cast %6 : i32 to index
    %c0_4 = arith.constant 0 : index
    %8 = vector.load %arg5[%7, %c0_4] : memref<256x4xf32, #tpu.memory_space<vmem>>, vector<128x4xf32>
    %c0_i32_5 = arith.constant 0 : i32
    %9 = arith.index_cast %c0_i32_5 : i32 to index
    %c0_6 = arith.constant 0 : index
    %c0_7 = arith.constant 0 : index
    %10 = vector.load %arg2[%9, %c0_6, %c0_7] : memref<1x8x128xf32, #tpu.memory_space<vmem>>, vector<1x8x128xf32>
    %11 = vector.shape_cast %10 : vector<1x8x128xf32> to vector<8x128xf32>
    %cst = arith.constant dense<0.000000e+00> : vector<8x128xf32>
    %12 = tpu.matmul %3, %11, %cst {dimension_numbers = #tpu.dot_dimension_numbers<[1], [0], [0], [1], [0, 0, 1, 1], [], []>} : vector<8x8xf32>, vector<8x128xf32>, vector<8x128xf32> -> vector<8x128xf32>
    %13 = vector.broadcast %4 : vector<8x1xf32> to vector<8x128xf32>
    %14 = arith.addf %12, %13 : vector<8x128xf32>
    %15 = arith.mulf %14, %14 : vector<8x128xf32>
    %cst_8 = arith.constant 0.000000e+00 : f32
    %16 = vector.broadcast %cst_8 : f32 to vector<8x128xf32>
    %17 = arith.subf %16, %15 : vector<8x128xf32>
    %18 = math.exp %17 : vector<8x128xf32>
    %cst_9 = arith.constant dense<0.000000e+00> : vector<128xf32>
    %19 = vector.multi_reduction <add>, %18, %cst_9 [0] : vector<8x128xf32> to vector<128xf32>
    %20 = vector.shape_cast %19 : vector<128xf32> to vector<1x128xf32>
    %cst_10 = arith.constant 9.99999974E-6 : f32
    %21 = vector.broadcast %cst_10 : f32 to vector<1x128xf32>
    %22 = arith.addf %20, %21 : vector<1x128xf32>
    %23 = tpu.reciprocal %22 {approx = true} : vector<1x128xf32> -> vector<1x128xf32>
    %24 = arith.mulf %22, %23 : vector<1x128xf32>
    %cst_11 = arith.constant 2.000000e+00 : f32
    %25 = vector.broadcast %cst_11 : f32 to vector<1x128xf32>
    %26 = arith.subf %25, %24 : vector<1x128xf32>
    %27 = arith.mulf %23, %26 : vector<1x128xf32>
    %28 = vector.broadcast %27 : vector<1x128xf32> to vector<8x128xf32>
    %29 = arith.mulf %18, %28 : vector<8x128xf32>
    %30 = arith.index_cast %c0_i32_5 : i32 to index
    %c0_12 = arith.constant 0 : index
    %c0_13 = arith.constant 0 : index
    %31 = vector.load %arg6[%30, %c0_12, %c0_13] : memref<1x8x4xf32, #tpu.memory_space<vmem>>, vector<1x8x4xf32>
    %32 = vector.shape_cast %31 : vector<1x8x4xf32> to vector<8x4xf32>
    %cst_14 = arith.constant dense<0.000000e+00> : vector<8x4xf32>
    %33 = tpu.matmul %29, %8, %cst_14 {dimension_numbers = #tpu.dot_dimension_numbers<[1], [0], [0], [1], [0, 0, 1, 1], [], []>} : vector<8x128xf32>, vector<128x4xf32>, vector<8x4xf32> -> vector<8x4xf32>
    %34 = arith.addf %32, %33 : vector<8x4xf32>
    %35 = arith.index_cast %c0_i32_5 : i32 to index
    %c0_15 = arith.constant 0 : index
    %c0_16 = arith.constant 0 : index
    %36 = vector.load %arg6[%35, %c0_15, %c0_16] : memref<1x8x4xf32, #tpu.memory_space<vmem>>, vector<1x8x4xf32>
    %37 = vector.shape_cast %36 : vector<1x8x4xf32> to vector<8x4xf32>
    %38 = vector.shape_cast %34 : vector<8x4xf32> to vector<1x8x4xf32>
    tpu.vector_store %arg6[%35, %c0_15, %c0_16], %38 {strides = array<i32>} : memref<1x8x4xf32, #tpu.memory_space<vmem>>, vector<1x8x4xf32>,
    %c1_i32 = arith.constant 1 : i32
    return
  }
  func.func @transform_0(%arg0: i32, %arg1: i32) -> (i32, i32, i32) {
    %c0_i32 = arith.constant 0 : i32
    %c0_i32_0 = arith.constant 0 : i32
    return %arg0, %c0_i32, %arg1 : i32, i32, i32
  }
  func.func @transform_1(%arg0: i32, %arg1: i32) -> (i32, i32) {
    %c0_i32 = arith.constant 0 : i32
    %c0_i32_0 = arith.constant 0 : i32
    %c0_i32_1 = arith.constant 0 : i32
    return %c0_i32, %c0_i32_0 : i32, i32
  }
  func.func @transform_2(%arg0: i32, %arg1: i32) -> (i32, i32) {
    %c0_i32 = arith.constant 0 : i32
    %c0_i32_0 = arith.constant 0 : i32
    %c0_i32_1 = arith.constant 0 : i32
    return %c0_i32, %c0_i32_0 : i32, i32
  }
  func.func @transform_3(%arg0: i32, %arg1: i32) -> (i32, i32) {
    %c0_i32 = arith.constant 0 : i32
    %c0_i32_0 = arith.constant 0 : i32
    %c0_i32_1 = arith.constant 0 : i32
    return %c0_i32, %c0_i32_0 : i32, i32
  }
  func.func @transform_4(%arg0: i32, %arg1: i32) -> (i32, i32, i32) {
    %c0_i32 = arith.constant 0 : i32
    %c0_i32_0 = arith.constant 0 : i32
    %c0_i32_1 = arith.constant 0 : i32
    return %arg0, %c0_i32, %c0_i32_0 : i32, i32, i32
  }
}

</mosaic_0001>

<bundles_post_ra>
// kernel: tpu_custom_call.1
= control target key start
LH: loop header
LB: loop body
LE: loop exit
PB: predicated region body
PF: predicated region fallthrough
CT: control target
= control target key end

     0   :  { %s703_s15 = smov 0   ;;  %s705_s16 = smov 0   ;;  %s792_s0 = inlined_call_operand.vmem [shape: f32[2,8,256], index: 0, kind: input, shape index: {}]   ;;  %s793_s1 = inlined_call_operand.vmem [shape: f32[8,8], index: 1, kind: input, shape index: {}]   ;;  %s794_s2 = inlined_call_operand.vmem [shape: f32[8,1], index: 2, kind: input, shape index: {}]   ;;  %s795_s3 = inlined_call_operand.vmem [shape: f32[256,4], index: 3, kind: input, shape index: {}]   ;;  %s796_s4 = inlined_call_operand.vmem [shape: f32[2,8,4], index: 4, kind: output, shape index: {}]  }
   0x1   :  { %s707_s17 = smov 0   ;;  %s709_s18 = smov 0  }
   0x2   :  { %s711_s19 = smov 0  }
   0x3 LB: > { %s23_s20 = sadd.s32 1, %s663_s17  ;;  %s26_s21 = sadd.s32 1, %s667_s18  ;;  %s671_s19 = sphi %s711_s19, %s14_s19   ;;  %s667_s18 = sphi %s709_s18, %s800_s18   ;;  %s663_s17 = sphi %s707_s17, %s799_s17   ;;  %s659_s16 = sphi %s705_s16, %s798_s16   ;;  %s655_s15 = sphi %s703_s15, %s797_s15  }
   0x4   : > { %p24_p0 = scmp.ge.s32.totalorder %s23_s20, 2  ;;  %p491_p1 = scmp.ge.s32.totalorder %s671_s19, 1 }
   0x5   : > { %p179_p2 = scmp.lt.s32.totalorder %s671_s19, 5 }
   0x6   : > { %s802_s20 = smov (%p24_p0, %s23_s20), 0  ;;  %s804_s21 = smov (!%p24_p0, %s26_s21), %s667_s18 }
   0x7   : > { %p180_p3 = pnand %p491_p1, %p179_p2  ;;  %p28_p4 = scmp.ge.s32.totalorder %s804_s21, 2 }
   0x8   : > { %p207_p5 = scmp.lt.s32.totalorder (!%p180_p3), %s659_s16, 1  ;;  %p209_p6 = scmp.lt.s32.totalorder (!%p180_p3), %s655_s15, 1 }
   0x9   : > { %s806_s21 = smov (%p28_p4, %s804_s21), 0  ;;  %183 = sbr.rel (%p180_p3) target bundleno = 505 (0x1f9), region = 36 }
   0xa   : > { %p495_p7 = scmp.ne.s32.totalorder (!%p180_p3), %s655_s15, 0 }
  0x10   : > { %s808_s16 = smov (!%p207_p5, %s659_s16), 1  ;;  %222 = sbr.rel (%p495_p7) target bundleno = 23 (0x17), region = 40 }
  0x11   : > { %s210_s22 = scalar_select %p209_p6, %s655_s15, 1 }
  0x12   : > { %s492_s23 = sshll.u32 %s808_s16, 1  ;;  %s494_s24 = sshll.u32 %s808_s16, 3  ;;  %vm223_vm0 = vcmask (!%p495_p7), 31744   ;;  %v673_v0 = vmov (!%p495_p7), 0.0  }
  0x13   : > { %s212_s25 = sadd.s32 %s492_s23, %s210_s22  ;;  %s740_s28 = scalar_lea.vmem %s796_s4, %s494_s24 }
  0x14   : > { %s493_s29 = sshll.u32 %s212_s25, 3  ;;  %224 = vst.msk [vmem:[%s740_s28] sm:$0xff] (!%p495_p7), %vm223_vm0, %v673_v0 }
  0x15   : > { %s214_s6 = scalar_lea.vmem %s792_s0, %s493_s29 }
  0x17 PF: > { %v245_v1 = vld [vmem:[%s214_s6] sm:$0xff]  ;;  %vm251_vm1 = vcmask 64512   ;;  %v674_v3 = vmov 0.0   ;;  %vm675_vm2 = vmmov 0   ;;  %v676_v5 = vmov 0   ;;  %s496_s11 = sshll.u32 %s655_s15, 7 }
  0x18   : > { %v225_v2 = vld [vmem:[%s793_s1] sm:$0xff]  ;;  %519 = vmatprep.subr.mxu0 %v674_v3  ;;  %521 = vmatprep.mubr.msk.f32.mxu0 %vm675_vm2, %v674_v3  ;;  %v677_v6 = vmov 0.0|0.0   ;;  %s757_s14 = scalar_lea.vmem %s795_s3, %s496_s11  ;;  %vm413_vm3 = vcmask 31744  }
  0x19   : > { %v226_v4 = vld [vmem:[%s794_s2] sm:$0xff]  ;;  %520 = vmatpush3.msra.mxu0 %v245_v1  ;;  %628 = vset.pattern.permute.xlu0 %v676_v5  ;;  %v230_v8 = vld [vmem:[%s757_s14 + $0x8] sm:$0xff]  ;;  %v231_v9 = vld [vmem:[%s757_s14 + $0x10] sm:$0xff] }
  0x1a   : > { %522 = vmatmul.mubr.msk.f32.vlgmr.msra.gmra.mrb[0].mxu0 %vm251_vm1, %v225_v2  ;;  %248 = vperm.xlu0 %628, %v226_v4   ;;  %v229_v7 = vld [vmem:[%s757_s14] sm:$0xff]  ;;  %v232_v11 = vld [vmem:[%s757_s14 + $0x18] sm:$0xff]  ;;  %v234_v14 = vld [vmem:[%s757_s14 + $0x28] sm:$0xff] }
  0x1b   : > { %556 = vmatprep.mubr.msk.f32.mxu1 %vm675_vm2, %v674_v3  ;;  %559 = vmatprep.subr.bf16.mxu1 %v677_v6  ;;  %v560_v10 = vpack.c.bf16 %v230_v8, %v229_v7  ;;  %v563_v12 = vpack.c.bf16 %v232_v11, %v231_v9  ;;  %v233_v13 = vld [vmem:[%s757_s14 + $0x20] sm:$0xff]  ;;  %v235_v16 = vld [vmem:[%s757_s14 + $0x30] sm:$0xff]  ;;  %v236_v17 = vld [vmem:[%s757_s14 + $0x38] sm:$0xff] }
  0x1c   : > { %v566_v15 = vpack.c.bf16 %v234_v14, %v233_v13  ;;  %v569_v18 = vpack.c.bf16 %v236_v17, %v235_v16  ;;  %v237_v19 = vld [vmem:[%s757_s14 + $0x40] sm:$0xff]  ;;  %v238_v20 = vld [vmem:[%s757_s14 + $0x48] sm:$0xff]  ;;  %v239_v22 = vld [vmem:[%s757_s14 + $0x50] sm:$0xff] }
  0x1d   : > { %561 = vmatpush3.bf16.msra.mxu1 %v560_v10  ;;  %v572_v21 = vpack.c.bf16 %v238_v20, %v237_v19  ;;  %v240_v23 = vld [vmem:[%s757_s14 + $0x58] sm:$0xff]  ;;  %v241_v25 = vld [vmem:[%s757_s14 + $0x60] sm:$0xff]  ;;  %v242_v26 = vld [vmem:[%s757_s14 + $0x68] sm:$0xff] }
  0x1e   : > { %562 = vmatprep.subr.bf16.mxu1 %v677_v6  ;;  %v575_v24 = vpack.c.bf16 %v240_v23, %v239_v22  ;;  %v578_v27 = vpack.c.bf16 %v242_v26, %v241_v25  ;;  %v243_v28 = vld [vmem:[%s757_s14 + $0x70] sm:$0xff]  ;;  %v244_v29 = vld [vmem:[%s757_s14 + $0x78] sm:$0xff]  ;;  %v341_v51 = vld [vmem:[%s740_s28] sm:$0xff] }
  0x1f   : > { %v581_v30 = vpack.c.bf16 %v244_v29, %v243_v28 }
  0x21   : > { %564 = vmatpush3.bf16.msra.mxu1 %v563_v12 }
  0x22   : > { %565 = vmatprep.subr.bf16.mxu1 %v677_v6 }
  0x25   : > { %567 = vmatpush3.bf16.msra.mxu1 %v566_v15 }
  0x26   : > { %568 = vmatprep.subr.bf16.mxu1 %v677_v6 }
  0x29   : > { %570 = vmatpush3.bf16.msra.mxu1 %v569_v18 }
  0x2a   : > { %571 = vmatprep.subr.bf16.mxu1 %v677_v6 }
  0x2d   : > { %573 = vmatpush3.bf16.msra.mxu1 %v572_v21 }
  0x2e   : > { %574 = vmatprep.subr.bf16.mxu1 %v677_v6 }
  0x31   : > { %576 = vmatpush3.bf16.msra.mxu1 %v575_v24 }
  0x32   : > { %577 = vmatprep.subr.bf16.mxu1 %v677_v6 }
  0x35   : > { %579 = vmatpush3.bf16.msra.mxu1 %v578_v27 }
  0x36   : > { %580 = vmatprep.subr.bf16.mxu1 %v677_v6 }
  0x39   : > { %582 = vmatpush3.bf16.msra.mxu1 %v581_v30 }
  0x99   : > { %v249_v31 = vpop.permute.xlu0 %248 }
  0xed   : > { %v321_v32 = vpop.f32.mrb[0].mxu0 }
  0xee   : > { %v322_v33 = vadd.f32 %v321_v32, %v249_v31  ;;  %v523_v34 = vpop.f32.mrb[1].mxu0 }
  0xf0   : > { %v325_v35 = vmul.f32 %v322_v33, %v322_v33 }
  0xf2   : > { %v326_v36 = vsub.f32 0.0, %v325_v35 }
  0xf4   : > { %v327_v37 = vmul.f32 1.442695, %v326_v36 }
  0xf6   : > { %629 = vpow2.f32 %v327_v37 }
 0x100   : > { %v630_v38 = vpop.eup %629 }
 0x101   : > { %v329_v39 = vrot.slane %v630_v38, 4 }
 0x103   : > { %v330_v40 = vadd.f32 %v630_v38, %v329_v39 }
 0x105   : > { %v331_v41 = vrot.slane %v330_v40, 2 }
 0x107   : > { %v332_v42 = vadd.f32 %v331_v41, %v330_v40 }
 0x109   : > { %v333_v43 = vrot.slane %v332_v42, 1 }
 0x10b   : > { %v334_v44 = vadd.f32 %v333_v43, %v332_v42 }
 0x10d   : > { %v335_v45 = vadd.f32 1e-05, %v334_v44 }
 0x10f   : > { %631 = vrcp.f32 %v335_v45 }
 0x119   : > { %v632_v46 = vpop.eup %631 }
 0x11a   : > { %v337_v47 = vmul.f32 %v632_v46, %v335_v45 }
 0x11c   : > { %v338_v48 = vsub.f32 2.0, %v337_v47 }
 0x11e   : > { %v339_v49 = vmul.f32 %v632_v46, %v338_v48 }
 0x120   : > { %v340_v50 = vmul.f32 %v630_v38, %v339_v49 }
 0x122   : > { %557 = vmatmul.mubr.f32.vlgmr.msra.gmra.mrb[0].mxu1 %v340_v50 }
 0x1f5   : > { %v408_v52 = vpop.f32.mrb[0].mxu1 }
 0x1f6   : > { %v412_v53 = vadd.f32 %v408_v52, %v341_v51  ;;  %v558_v54 = vpop.f32.mrb[1].mxu1 }
 0x1f8   : > { %414 = vst.msk [vmem:[%s740_s28] sm:$0xff] %vm413_vm3, %v412_v53 }
 0x1f9 PF: > { %s14_s19 = sadd.s32 1, %s671_s19   ;;  %s797_s15 = smov %s663_s17 }
 0x1fa   : > { %p11_p8 = scmp.ge.s32.totalorder %s14_s19, 6   ;;  %s798_s16 = smov %s667_s18 }
 0x1fb   : > { %s799_s17 = smov %s802_s20  ;;  %s800_s18 = smov %s806_s21 }
 0x1fc   :  { %13 = sbr.rel (!%p11_p8) target bundleno = 3 (0x3), region = 71 }

</bundles_post_ra>
